<compile_context>
chip_gen: v6e
topology: v6e:2x2x1
jax: 0.10.0
libtpu: 0.0.40
codegen_flags: <defaults>
</compile_context>

<pallas_src>
import jax
import jax.numpy as jnp
from jax.experimental import pallas as pl
from jax.experimental.pallas import tpu as pltpu

HIDDEN = 64
MAX_TILE_B = 512   # sized to stay well inside v7x's 64 MiB VMEM with double-buffering


def _round_up(x, m):
    return ((x + m - 1) // m) * m


def _dueling_kernel(x_ref, w1_ref, b1_ref, w2_ref, b2_ref, w3_ref, b3_ref, out_ref):
    x = x_ref[...]                                                                   # (TB, S)
    h1 = jnp.dot(x, w1_ref[...], preferred_element_type=jnp.float32) + b1_ref[...]
    h1 = jnp.maximum(h1, 0.0)                                                        # (TB, 64)
    h2 = jnp.dot(h1, w2_ref[...], preferred_element_type=jnp.float32) + b2_ref[...]
    h2 = jnp.maximum(h2, 0.0)                                                        # (TB, 64)
    # Fused (value + scaled-advantage) head, lane-dense padded to a multiple of 128.
    out_ref[...] = (jnp.dot(h2, w3_ref[...], preferred_element_type=jnp.float32)
                    + b3_ref[...])                                                   # (TB, OUT_PAD)


def _fuse_head(params, action_size):
    """Fold v + (a - a/A) = v + a*(A-1)/A into a single lane-dense head weight."""
    scale = (action_size - 1.0) / float(action_size)
    wv, bv = params["wv"], params["bv"]          # (64, 1), (1, 1)
    wa, ba = params["wa"], params["ba"]          # (64, A), (1, A)
    w3 = wv + scale * wa                         # (64, A): column j = wv[:,0] + scale*wa[:,j]
    b3 = bv + scale * ba                         # (1, A)
    out_pad = _round_up(max(action_size, 128), 128)
    w3 = jnp.pad(w3, ((0, 0), (0, out_pad - action_size)))
    b3 = jnp.pad(b3, ((0, 0), (0, out_pad - action_size)))
    return w3, b3, out_pad


def dueling_forward(state, params):
    """state: (B, state_size) f32; params: transposed (in, out) weights + (1, out) biases."""
    batch, state_size = state.shape
    action_size = params["wa"].shape[1]
    w3, b3, out_pad = _fuse_head(params, action_size)

    # Batch tiling: multiple of 8 sublanes, capped at MAX_TILE_B; pad B to a whole tile.
    tile_b = min(MAX_TILE_B, _round_up(batch, 8))
    padded_b = _round_up(batch, tile_b)
    x = state if padded_b == batch else jnp.pad(state, ((0, padded_b - batch), (0, 0)))
    grid = (padded_b // tile_b,)

    const = lambda i: (0, 0)   # weights/biases stay resident in VMEM across grid steps

    flops = 2 * padded_b * (state_size * HIDDEN + HIDDEN * HIDDEN + HIDDEN * out_pad)
    bytes_accessed = 4 * (padded_b * (state_size + out_pad)
                          + state_size * HIDDEN + HIDDEN * HIDDEN + HIDDEN * out_pad
                          + 2 * HIDDEN + out_pad)

    out_padded = pl.pallas_call(
        _dueling_kernel,
        out_shape=jax.ShapeDtypeStruct((padded_b, out_pad), jnp.float32),
        grid=grid,
        in_specs=[
            pl.BlockSpec((tile_b, state_size), lambda i: (i, 0)),   # state tile
            pl.BlockSpec((state_size, HIDDEN), const),              # w1
            pl.BlockSpec((1, HIDDEN), const),                       # b1
            pl.BlockSpec((HIDDEN, HIDDEN), const),                  # w2
            pl.BlockSpec((1, HIDDEN), const),                       # b2
            pl.BlockSpec((HIDDEN, out_pad), const),                 # fused head weight
            pl.BlockSpec((1, out_pad), const),                      # fused head bias
        ],
        out_specs=pl.BlockSpec((tile_b, out_pad), lambda i: (i, 0)),
        compiler_params=pltpu.CompilerParams(
            dimension_semantics=("parallel",)),
        cost_estimate=pl.CostEstimate(flops=flops, transcendentals=0,
                                      bytes_accessed=bytes_accessed),
    )(x, params["w1"], params["b1"], params["w2"], params["b2"], w3, b3)

    return out_padded[:batch, :action_size]


def init_params(key, state_size, action_size):
    """Mirror nn.Linear's U(-1/sqrt(fan_in), 1/sqrt(fan_in)); weights stored as (in, out)."""
    def linear(k, fan_in, fan_out):
        kw, kb = jax.random.split(k)
        bound = 1.0 / jnp.sqrt(jnp.float32(fan_in))
        w = jax.random.uniform(kw, (fan_in, fan_out), jnp.float32, -bound, bound)
        b = jax.random.uniform(kb, (1, fan_out), jnp.float32, -bound, bound)
        return w, b

    k1, k2, k3, k4 = jax.random.split(key, 4)
    w1, b1 = linear(k1, state_size, HIDDEN)
    w2, b2 = linear(k2, HIDDEN, HIDDEN)
    wv, bv = linear(k3, HIDDEN, 1)
    wa, ba = linear(k4, HIDDEN, action_size)
    return {"w1": w1, "b1": b1, "w2": w2, "b2": b2,
            "wv": wv, "bv": bv, "wa": wa, "ba": ba}


def reference_forward(state, p):
    """Pure-JAX reference computed exactly like the PyTorch module (unfused heads)."""
    h1 = jnp.maximum(state @ p["w1"] + p["b1"], 0.0)
    h2 = jnp.maximum(h1 @ p["w2"] + p["b2"], 0.0)
    v = h2 @ p["wv"] + p["bv"]
    a = h2 @ p["wa"] + p["ba"]
    average_operator = (1.0 / a.shape[-1]) * a
    return v + (a - average_operator)


if __name__ == "__main__":
    batch, state_size, action_size = 2, 8, 4
    key = jax.random.PRNGKey(0)
    k_params, k_state = jax.random.split(key)

    params = init_params(k_params, state_size, action_size)
    state = jax.random.normal(k_state, (batch, state_size), jnp.float32)

    out = jax.block_until_ready(dueling_forward(state, params))
    ref = reference_forward(state, params)

    assert out.shape == (batch, action_size), out.shape
    assert jnp.allclose(out, ref, atol=1e-4, rtol=1e-4), (out, ref)
    print("KERNEL_OK")
</pallas_src>

<mosaic_0001>
module attributes {stable_mosaic.version = 11 : i64} {
  func.func @_dueling_kernel(%arg0: i32, %arg1: memref<8x8xf32, #tpu.memory_space<vmem>>, %arg2: memref<8x64xf32, #tpu.memory_space<vmem>>, %arg3: memref<1x64xf32, #tpu.memory_space<vmem>>, %arg4: memref<64x64xf32, #tpu.memory_space<vmem>>, %arg5: memref<1x64xf32, #tpu.memory_space<vmem>>, %arg6: memref<64x128xf32, #tpu.memory_space<vmem>>, %arg7: memref<1x128xf32, #tpu.memory_space<vmem>>, %arg8: memref<8x128xf32, #tpu.memory_space<vmem>>) attributes {dimension_semantics = [#tpu.dimension_semantics<parallel>], iteration_bounds = array<i64: 1>, scalar_prefetch = 0 : i64, scratch_operands = 0 : i64, tpu.core_type = #tpu.core_type<tc>, window_params = [{transform_indices = @transform_0, window_bounds = array<i64: 8, 8>}, {pipeline_mode = #tpu.pipeline_mode<synchronous>, transform_indices = @transform_1, window_bounds = array<i64: 8, 64>}, {pipeline_mode = #tpu.pipeline_mode<synchronous>, transform_indices = @transform_2, window_bounds = array<i64: 1, 64>}, {pipeline_mode = #tpu.pipeline_mode<synchronous>, transform_indices = @transform_3, window_bounds = array<i64: 64, 64>}, {pipeline_mode = #tpu.pipeline_mode<synchronous>, transform_indices = @transform_4, window_bounds = array<i64: 1, 64>}, {pipeline_mode = #tpu.pipeline_mode<synchronous>, transform_indices = @transform_5, window_bounds = array<i64: 64, 128>}, {pipeline_mode = #tpu.pipeline_mode<synchronous>, transform_indices = @transform_6, window_bounds = array<i64: 1, 128>}, {transform_indices = @transform_7, window_bounds = array<i64: 8, 128>}]} {
    %c0 = arith.constant 0 : index
    %c0_0 = arith.constant 0 : index
    %0 = vector.load %arg1[%c0, %c0_0] : memref<8x8xf32, #tpu.memory_space<vmem>>, vector<8x8xf32>
    %c0_1 = arith.constant 0 : index
    %c0_2 = arith.constant 0 : index
    %1 = vector.load %arg2[%c0_1, %c0_2] : memref<8x64xf32, #tpu.memory_space<vmem>>, vector<8x64xf32>
    %cst = arith.constant dense<0.000000e+00> : vector<8x64xf32>
    %2 = tpu.matmul %0, %1, %cst {dimension_numbers = #tpu.dot_dimension_numbers<[1], [0], [0], [1], [0, 0, 1, 1], [], []>} : vector<8x8xf32>, vector<8x64xf32>, vector<8x64xf32> -> vector<8x64xf32>
    %c0_3 = arith.constant 0 : index
    %c0_4 = arith.constant 0 : index
    %3 = vector.load %arg3[%c0_3, %c0_4] : memref<1x64xf32, #tpu.memory_space<vmem>>, vector<1x64xf32>
    %4 = vector.broadcast %3 : vector<1x64xf32> to vector<8x64xf32>
    %5 = arith.addf %2, %4 : vector<8x64xf32>
    %cst_5 = arith.constant 0.000000e+00 : f32
    %6 = vector.broadcast %cst_5 : f32 to vector<8x64xf32>
    %7 = arith.maximumf %5, %6 : vector<8x64xf32>
    %c0_6 = arith.constant 0 : index
    %c0_7 = arith.constant 0 : index
    %8 = vector.load %arg4[%c0_6, %c0_7] : memref<64x64xf32, #tpu.memory_space<vmem>>, vector<64x64xf32>
    %cst_8 = arith.constant dense<0.000000e+00> : vector<8x64xf32>
    %9 = tpu.matmul %7, %8, %cst_8 {dimension_numbers = #tpu.dot_dimension_numbers<[1], [0], [0], [1], [0, 0, 1, 1], [], []>} : vector<8x64xf32>, vector<64x64xf32>, vector<8x64xf32> -> vector<8x64xf32>
    %c0_9 = arith.constant 0 : index
    %c0_10 = arith.constant 0 : index
    %10 = vector.load %arg5[%c0_9, %c0_10] : memref<1x64xf32, #tpu.memory_space<vmem>>, vector<1x64xf32>
    %11 = vector.broadcast %10 : vector<1x64xf32> to vector<8x64xf32>
    %12 = arith.addf %9, %11 : vector<8x64xf32>
    %cst_11 = arith.constant 0.000000e+00 : f32
    %13 = vector.broadcast %cst_11 : f32 to vector<8x64xf32>
    %14 = arith.maximumf %12, %13 : vector<8x64xf32>
    %c0_12 = arith.constant 0 : index
    %c0_13 = arith.constant 0 : index
    %15 = vector.load %arg6[%c0_12, %c0_13] : memref<64x128xf32, #tpu.memory_space<vmem>>, vector<64x128xf32>
    %cst_14 = arith.constant dense<0.000000e+00> : vector<8x128xf32>
    %16 = tpu.matmul %14, %15, %cst_14 {dimension_numbers = #tpu.dot_dimension_numbers<[1], [0], [0], [1], [0, 0, 1, 1], [], []>} : vector<8x64xf32>, vector<64x128xf32>, vector<8x128xf32> -> vector<8x128xf32>
    %c0_15 = arith.constant 0 : index
    %c0_16 = arith.constant 0 : index
    %17 = vector.load %arg7[%c0_15, %c0_16] : memref<1x128xf32, #tpu.memory_space<vmem>>, vector<1x128xf32>
    %18 = vector.broadcast %17 : vector<1x128xf32> to vector<8x128xf32>
    %19 = arith.addf %16, %18 : vector<8x128xf32>
    %c0_17 = arith.constant 0 : index
    %c0_18 = arith.constant 0 : index
    %20 = vector.load %arg8[%c0_17, %c0_18] : memref<8x128xf32, #tpu.memory_space<vmem>>, vector<8x128xf32>
    tpu.vector_store %arg8[%c0_17, %c0_18], %19 {strides = array<i32>} : memref<8x128xf32, #tpu.memory_space<vmem>>, vector<8x128xf32>,
    return
  }
  func.func @transform_0(%arg0: i32) -> (i32, i32) {
    %c0_i32 = arith.constant 0 : i32
    %c0_i32_0 = arith.constant 0 : i32
    return %arg0, %c0_i32 : i32, i32
  }
  func.func @transform_1(%arg0: i32) -> (i32, i32) {
    %c0_i32 = arith.constant 0 : i32
    %c0_i32_0 = arith.constant 0 : i32
    %c0_i32_1 = arith.constant 0 : i32
    return %c0_i32, %c0_i32_0 : i32, i32
  }
  func.func @transform_2(%arg0: i32) -> (i32, i32) {
    %c0_i32 = arith.constant 0 : i32
    %c0_i32_0 = arith.constant 0 : i32
    %c0_i32_1 = arith.constant 0 : i32
    return %c0_i32, %c0_i32_0 : i32, i32
  }
  func.func @transform_3(%arg0: i32) -> (i32, i32) {
    %c0_i32 = arith.constant 0 : i32
    %c0_i32_0 = arith.constant 0 : i32
    %c0_i32_1 = arith.constant 0 : i32
    return %c0_i32, %c0_i32_0 : i32, i32
  }
  func.func @transform_4(%arg0: i32) -> (i32, i32) {
    %c0_i32 = arith.constant 0 : i32
    %c0_i32_0 = arith.constant 0 : i32
    %c0_i32_1 = arith.constant 0 : i32
    return %c0_i32, %c0_i32_0 : i32, i32
  }
  func.func @transform_5(%arg0: i32) -> (i32, i32) {
    %c0_i32 = arith.constant 0 : i32
    %c0_i32_0 = arith.constant 0 : i32
    %c0_i32_1 = arith.constant 0 : i32
    return %c0_i32, %c0_i32_0 : i32, i32
  }
  func.func @transform_6(%arg0: i32) -> (i32, i32) {
    %c0_i32 = arith.constant 0 : i32
    %c0_i32_0 = arith.constant 0 : i32
    %c0_i32_1 = arith.constant 0 : i32
    return %c0_i32, %c0_i32_0 : i32, i32
  }
  func.func @transform_7(%arg0: i32) -> (i32, i32) {
    %c0_i32 = arith.constant 0 : i32
    %c0_i32_0 = arith.constant 0 : i32
    return %arg0, %c0_i32 : i32, i32
  }
}

</mosaic_0001>

<bundles_post_ra>
// kernel: tpu_custom_call.1
= control target key start
LH: loop header
LB: loop body
LE: loop exit
PB: predicated region body
PF: predicated region fallthrough
CT: control target
= control target key end

     0   :  { %12 = vsyncpa [#allocation3], 0  ;;  %s622_s0 = inlined_call_operand.hbm [shape: f32[8,8], index: 0, kind: input, shape index: {}]   ;;  %s623_s1 = inlined_call_operand.hbm [shape: f32[8,64], index: 1, kind: input, shape index: {}]   ;;  %s624_s2 = inlined_call_operand.vmem [shape: f32[1,64], index: 2, kind: input, shape index: {}]   ;;  %s625_s3 = inlined_call_operand.hbm [shape: f32[64,64], index: 3, kind: input, shape index: {}]   ;;  %s626_s4 = inlined_call_operand.vmem [shape: f32[1,64], index: 4, kind: input, shape index: {}]   ;;  %s627_s5 = inlined_call_operand.hbm [shape: f32[64,128], index: 5, kind: input, shape index: {}]   ;;  %s628_s6 = inlined_call_operand.vmem [shape: f32[1,128], index: 6, kind: input, shape index: {}]   ;;  %s629_s7 = inlined_call_operand.hbm [shape: f32[8,128], index: 7, kind: output, shape index: {}]  }
   0x1   :  { %13 = vsyncpa [#allocation6], 0 }
   0x2   :  { %14 = vsyncpa [#allocation9], 0 }
   0x3   :  { %15 = vsyncpa [#allocation4], 0  ;;  %s544_s24 = smov [#allocation5]   ;;  %s545_s26 = smov [#allocation2]  }
   0x4   :  { %s32_s25 = sshll.u32 %s544_s24, 4  ;;  %s22_s27 = sshll.u32 %s545_s26, 4  ;;  %s33_s25 = int_to_ptr.vmem [resolvable:$true] %s32_s25  ;;  %s23_s27 = int_to_ptr.vmem [resolvable:$true] %s22_s27 }
   0x5   :  { %s444_s28 = scalar_lea.vmem %s33_s25, 128  ;;  %p449_p1 = scmp.lt.s32.totalorder %s33_s25, %s33_s25 }
   0x6   :  { %p445_p0 = scmp.ne.s32.totalorder %s33_s25, %s444_s28  ;;  %p450_p2 = scmp.lt.s32.totalorder %s444_s28, %s444_s28 }
   0x8   :  { %p451_p3 = por %p450_p2, %p449_p1 }
   0xa   :  { %p452_p4 = pnand %p451_p3, %p445_p0 }
   0xc   :  { %455 = shalt.err (!%p452_p4)
}
   0xd   :  { %35 = dma.hbm_to_vmem [thread:$0]  %s623_s1, 128, %s33_s25, [#allocation6]  }
   0xe   :  { %s464_s8 = scalar_lea.vmem %s23_s27, 128  ;;  %p469_p6 = scmp.lt.s32.totalorder %s23_s27, %s23_s27 }
   0xf   :  { %p465_p5 = scmp.ne.s32.totalorder %s23_s27, %s464_s8  ;;  %p470_p7 = scmp.lt.s32.totalorder %s464_s8, %s464_s8 }
  0x11   :  { %p471_p8 = por %p470_p7, %p469_p6 }
  0x13   :  { %p472_p9 = pnand %p471_p8, %p465_p5 }
  0x15   :  { %475 = shalt.err (!%p472_p9)
}
  0x16   :  { %25 = dma.hbm_to_vmem [thread:$0]  %s622_s0, 128, %s23_s27, [#allocation3]  }
  0x17   :  { %s546_s11 = smov [#allocation7]  }
  0x18   :  { %s43_s12 = sshll.u32 %s546_s11, 4  ;;  %s44_s12 = int_to_ptr.vmem [resolvable:$true] %s43_s12 }
  0x19   :  { %s484_s13 = scalar_lea.vmem %s44_s12, 1024  ;;  %p489_p11 = scmp.lt.s32.totalorder %s44_s12, %s44_s12 }
  0x1a   :  { %p485_p10 = scmp.ne.s32.totalorder %s44_s12, %s484_s13  ;;  %p490_p12 = scmp.lt.s32.totalorder %s484_s13, %s484_s13 }
  0x1c   :  { %p491_p13 = por %p490_p12, %p489_p11 }
  0x1e   :  { %p492_p0 = pnand %p491_p13, %p485_p10 }
  0x20   :  { %495 = shalt.err (!%p492_p0)
}
  0x21   :  { %s547_s1 = smov 128   ;;  %s548_s14 = smov 8  }
  0x22   :  { %49 = dma.hbm_to_vmem [thread:$0]  %s625_s3, 1024, %s44_s12, [#allocation6], %s547_s1, %s547_s1, %s548_s14  }
  0x23   :  { %s549_s17 = smov [#allocation8]  }
  0x24   :  { %s57_s18 = sshll.u32 %s549_s17, 4  ;;  %s58_s18 = int_to_ptr.vmem [resolvable:$true] %s57_s18 }
  0x25   :  { %s504_s0 = scalar_lea.vmem %s58_s18, 1024  ;;  %p509_p2 = scmp.lt.s32.totalorder %s58_s18, %s58_s18 }
  0x26   :  { %p505_p1 = scmp.ne.s32.totalorder %s58_s18, %s504_s0  ;;  %p510_p3 = scmp.lt.s32.totalorder %s504_s0, %s504_s0 }
  0x28   :  { %p511_p4 = por %p510_p3, %p509_p2 }
  0x2a   :  { %p512_p5 = pnand %p511_p4, %p505_p1 }
  0x2c   :  { %515 = shalt.err (!%p512_p5)
}
  0x2d   :  { %63 = dma.hbm_to_vmem [thread:$0]  %s627_s5, 1024, %s58_s18, [#allocation9], %s547_s1, %s547_s1, %s548_s14  }
  0x2e   :  { %536 = dma.done.wait [#allocation3], 128  }
  0x2f   :  { %537 = vsyncadd [#allocation3], 4294967168 }
  0x30   :  { %538 = dma.done.wait [#allocation6], 1152  }
  0x31   :  { %539 = vsyncadd [#allocation6], 4294966144 }
  0x32   :  { %540 = dma.done.wait [#allocation9], 1024  }
  0x33   :  { %541 = vsyncadd [#allocation9], 4294966272  ;;  %v550_v0 = vmov 0.0   ;;  %vm551_vm0 = vmmov 0   ;;  %vm87_vm1 = vcmask 64512   ;;  %v79_v1 = vld [vmem:[#allocation5] sm:$0xff] }
  0x34   :  { %384 = vmatprep.subr.mxu0 %v550_v0  ;;  %386 = vmatprep.mubr.msk.f32.mxu0 %vm551_vm0, %v550_v0  ;;  %v78_v2 = vld [vmem:[#allocation2] sm:$0xff]  ;;  %v169_v3 = vld [vmem:[#allocation7 + $0x38] sm:$0xff]  ;;  %v167_v5 = vld [vmem:[#allocation7 + $0x28] sm:$0xff]  ;;  %vm177_vm2 = vcmask 523264   ;;  %s552_s24 = smov [#allocation10]  }
  0x35   :  { %389 = vmatprep.subr.mxu1 %v550_v0  ;;  %405 = vmatprep.mubr.msk.f32.mxu1 %vm551_vm0, %v550_v0  ;;  %v168_v4 = vld [vmem:[#allocation7 + $0x30] sm:$0xff]  ;;  %v166_v6 = vld [vmem:[#allocation7 + $0x20] sm:$0xff]  ;;  %v165_v7 = vld [vmem:[#allocation7 + $0x18] sm:$0xff]  ;;  %s347_s25 = sshll.u32 %s552_s24, 4  ;;  %s348_s25 = int_to_ptr.vmem [resolvable:$true] %s347_s25 }
  0x36   :  { %385 = vmatpush3.msra.mxu0 %v79_v1  ;;  %390 = vmatpush3.msra.mxu1 %v169_v3  ;;  %v164_v8 = vld [vmem:[#allocation7 + $0x10] sm:$0xff]  ;;  %v163_v9 = vld [vmem:[#allocation7 + $0x8] sm:$0xff]  ;;  %v162_v10 = vld [vmem:[#allocation7] sm:$0xff]  ;;  %s516_s26 = scalar_lea.vmem %s348_s25, 128  ;;  %p521_p7 = scmp.lt.s32.totalorder %s348_s25, %s348_s25 }
  0x37   :  { %387 = vmatmul.mubr.msk.f32.vlgmr.msra.gmra.mxu0 %vm87_vm1, %v78_v2  ;;  %391 = vmatprep.subr.mxu1 %v550_v0  ;;  %v259_v11 = vld [vmem:[#allocation8 + $0x38] sm:$0xff]  ;;  %v258_v12 = vld [vmem:[#allocation8 + $0x30] sm:$0xff]  ;;  %v257_v13 = vld [vmem:[#allocation8 + $0x28] sm:$0xff]  ;;  %p517_p6 = scmp.ne.s32.totalorder %s348_s25, %s516_s26  ;;  %p522_p8 = scmp.lt.s32.totalorder %s516_s26, %s516_s26 }
  0x38   :  { %392 = vmatpush3.msra.mxu1 %v168_v4  ;;  %408 = vmatprep.subr.mxu0 %v550_v0  ;;  %v256_v14 = vld [vmem:[#allocation8 + $0x20] sm:$0xff]  ;;  %v255_v15 = vld [vmem:[#allocation8 + $0x18] sm:$0xff]  ;;  %v358_v16 = vld [vmem:[%s624_s2] ss:$0 sm:$0xff] }
  0x39   :  { %393 = vmatprep.subr.mxu1 %v550_v0  ;;  %424 = vmatprep.mubr.msk.f32.mxu0 %vm551_vm0, %v550_v0  ;;  %v254_v21 = vld [vmem:[#allocation8 + $0x10] sm:$0xff]  ;;  %v253_v22 = vld [vmem:[#allocation8 + $0x8] sm:$0xff]  ;;  %v252_v23 = vld [vmem:[#allocation8] sm:$0xff]  ;;  %p523_p9 = por %p522_p8, %p521_p7 }
  0x3a   :  { %394 = vmatpush3.msra.mxu1 %v167_v5  ;;  %409 = vmatpush3.msra.mxu0 %v259_v11  ;;  %v360_v24 = vld [vmem:[%s626_s4] ss:$0 sm:$0xff] }
  0x3b   :  { %395 = vmatprep.subr.mxu1 %v550_v0  ;;  %410 = vmatprep.subr.mxu0 %v550_v0  ;;  %v362_v29 = vld [vmem:[%s628_s6] ss:$0 sm:$0xff]  ;;  %p524_p10 = pnand %p523_p9, %p517_p6 }
  0x3c   :  { %396 = vmatpush3.msra.mxu1 %v166_v6  ;;  %411 = vmatpush3.msra.mxu0 %v258_v12 }
  0x3d   :  { %397 = vmatprep.subr.mxu1 %v550_v0  ;;  %412 = vmatprep.subr.mxu0 %v550_v0 }
  0x3e   :  { %398 = vmatpush3.msra.mxu1 %v165_v7  ;;  %413 = vmatpush3.msra.mxu0 %v257_v13 }
  0x3f   :  { %399 = vmatprep.subr.mxu1 %v550_v0  ;;  %414 = vmatprep.subr.mxu0 %v550_v0 }
  0x40   :  { %400 = vmatpush3.msra.mxu1 %v164_v8  ;;  %415 = vmatpush3.msra.mxu0 %v256_v14 }
  0x41   :  { %401 = vmatprep.subr.mxu1 %v550_v0  ;;  %416 = vmatprep.subr.mxu0 %v550_v0 }
  0x42   :  { %402 = vmatpush3.msra.mxu1 %v163_v9  ;;  %417 = vmatpush3.msra.mxu0 %v255_v15 }
  0x43   :  { %403 = vmatprep.subr.mxu1 %v550_v0  ;;  %418 = vmatprep.subr.mxu0 %v550_v0 }
  0x44   :  { %404 = vmatpush3.msra.mxu1 %v162_v10  ;;  %419 = vmatpush3.msra.mxu0 %v254_v21 }
  0x45   :  { %420 = vmatprep.subr.mxu0 %v550_v0 }
  0x46   :  { %421 = vmatpush3.msra.mxu0 %v253_v22 }
  0x47   :  { %422 = vmatprep.subr.mxu0 %v550_v0 }
  0x48   :  { %423 = vmatpush3.msra.mxu0 %v252_v23 }
  0xf7   :  { %v157_v17 = vpop.f32.mrf.mxu0 }
  0xf8   :  { %v158_v18 = vadd.f32 %v358_v16, %v157_v17 }
  0xf9   :  { %v388_v19 = vpop.f32.mrf.mxu0 }
  0xfa   :  { %v161_v20 = vmax.f32 %v158_v18, 0.0 }
  0xfc   :  { %406 = vmatmul.mubr.msk.f32.vlgmr.msra.gmra.mxu1 %vm177_vm2, %v161_v20 }
 0x1bc   :  { %v247_v25 = vpop.f32.mrf.mxu1 }
 0x1bd   :  { %v248_v26 = vadd.f32 %v360_v24, %v247_v25 }
 0x1be   :  { %v407_v27 = vpop.f32.mrf.mxu1 }
 0x1bf   :  { %v251_v28 = vmax.f32 %v248_v26, 0.0 }
 0x1c1   :  { %425 = vmatmul.mubr.msk.f32.vlgmr.msra.gmra.mxu0 %vm177_vm2, %v251_v28 }
 0x281   :  { %v336_v30 = vpop.f32.mrf.mxu0 }
 0x282   :  { %v337_v31 = vadd.f32 %v362_v29, %v336_v30 }
 0x283   :  { %v426_v32 = vpop.f32.mrf.mxu0 }
 0x284   :  { %340 = vst [vmem:[#allocation10] sm:$0xff] %v337_v31 }
 0x285   :  { %527 = shalt.err (!%p524_p10)
}
 0x286   :  { %350 = dma.vmem_to_hbm [thread:$0]  %s348_s25, 128, %s629_s7, [#allocation4]  }
 0x287   :  { %542 = dma.done.wait [#allocation4], 128  }
 0x288   :  { %543 = vsyncadd [#allocation4], 4294967168 }
 0x289   :  { %354 = vsyncpa [#allocation3], 1 }
 0x28a   :  { %355 = vsyncpa [#allocation6], 1 }
 0x28b   :  { %356 = vsyncpa [#allocation9], 1 }
 0x28c   :  { %357 = vsyncpa [#allocation4], 1 }

</bundles_post_ra>
